<compile_context>
chip_gen: v7x
topology: tpu7x:2x2x1
jax: 0.10.0
libtpu: 0.0.40
codegen_flags: <defaults>
</compile_context>

<pallas_src>
import math

import jax
import jax.numpy as jnp
from jax.experimental import pallas as pl
from jax.experimental.pallas import tpu as pltpu

W = 2.0 * math.pi / 365.0  # fixed (non-learnable) frequency, as in the module


def _sine_kernel(params_ref, t_ref, o_ref):
    # params_ref: SMEM (2,) float32 -> [d, b]; read once into scalar locals.
    d = params_ref[0]
    b = params_ref[1]
    t = t_ref[...].astype(jnp.float32)
    # TODO(synk): on v7x (VALU-bound) a Cody-Waite range reduction + short
    # minimax polynomial would cut sin's op count ~30-40%; kept jnp.sin to
    # preserve torch.sin accuracy across the full input domain.
    o_ref[...] = (jnp.sin(jnp.float32(W) * t + d) + b).astype(o_ref.dtype)


def _round_down(x, m):
    return (x // m) * m


def _choose_tile_rows(rows, lane, sub):
    """Pick a sublane-aligned row tile ~2 MiB, guaranteeing >=2 grid tiles."""
    if rows <= sub:
        return rows  # single block; block == full array dim is always legal
    target = max(sub, _round_down((512 * 1024) // lane, sub))  # ~2 MiB f32
    tile = min(target, _round_down(rows, sub))
    if rows >= 2 * sub:
        # At least two tiles so v7x's two TensorCores both get work.
        tile = min(tile, max(sub, _round_down(rows // 2, sub)))
    return max(tile, sub)


def _run_slab(slab, params, tile_rows, out_dtype):
    rows, lane = slab.shape
    grid = (pl.cdiv(rows, tile_rows),)
    return pl.pallas_call(
        _sine_kernel,
        out_shape=jax.ShapeDtypeStruct((rows, lane), out_dtype),
        grid_spec=pltpu.PrefetchScalarGridSpec(
            num_scalar_prefetch=0,
            grid=grid,
            in_specs=[
                pl.BlockSpec(memory_space=pltpu.MemorySpace.SMEM),   # (2,) [d,b]
                pl.BlockSpec((tile_rows, lane), lambda i: (i, 0)),   # t tile
            ],
            out_specs=pl.BlockSpec((tile_rows, lane), lambda i: (i, 0)),
        ),
        compiler_params=pltpu.CompilerParams(
            dimension_semantics=("parallel",),        # megacore split on v7x
            vmem_limit_bytes=24 * 1024 * 1024,
        ),
    )(params, slab)


def sine_predictor(t, d, b):
    """Elementwise sin(W*t + d) + b on TPU via Pallas, any shape/dtype."""
    orig_shape = t.shape
    total = t.size
    out_dtype = t.dtype if jnp.issubdtype(t.dtype, jnp.floating) else jnp.float32
    if total == 0:
        return jnp.zeros(orig_shape, out_dtype)

    sub = 8 if jnp.dtype(t.dtype).itemsize >= 4 else 16   # packed sublanes
    params = jnp.stack([jnp.asarray(d, jnp.float32), jnp.asarray(b, jnp.float32)])
    flat = jnp.ravel(t)

    # Widest lane count (multiple of 128) that divides total -> fully copy-free.
    lane = 0
    for cand in (1024, 512, 256, 128):
        if total % cand == 0:
            lane = cand
            break

    if lane:
        rows = total // lane
        tile_rows = _choose_tile_rows(rows, lane, sub)
        out = _run_slab(flat.reshape(rows, lane), params, tile_rows, out_dtype)
        return out.reshape(orig_shape)

    # Ragged fallback (total not a multiple of 128): pad by < sub*128 elements
    # only; this path keeps the extra pad/slice passes confined to odd shapes.
    lane = 128
    padded = pl.cdiv(total, sub * lane) * sub * lane
    flat = jnp.pad(flat, (0, padded - total))
    rows = padded // lane
    tile_rows = _choose_tile_rows(rows, lane, sub)
    out = _run_slab(flat.reshape(rows, lane), params, tile_rows, out_dtype)
    return out.reshape(-1)[:total].reshape(orig_shape)


if __name__ == "__main__":
    key = jax.random.PRNGKey(0)

    # Deterministic parameters (the module initializes them to 0.0; use small
    # nonzero values so d and b are actually exercised).
    d = jnp.float32(0.1)
    b = jnp.float32(0.5)

    k1, k2, k3, k4 = jax.random.split(key, 4)

    def ref_fn(t):
        o = jnp.sin(jnp.float32(W) * t.astype(jnp.float32) + d) + b
        od = t.dtype if jnp.issubdtype(t.dtype, jnp.floating) else jnp.float32
        return o.astype(od)

    # 1) Small aligned input ("day" values), single full block.
    t1 = jax.random.uniform(k1, (16, 128), jnp.float32, minval=0.0, maxval=365.0)
    o1 = jax.block_until_ready(sine_predictor(t1, d, b))
    assert o1.shape == t1.shape and o1.dtype == t1.dtype
    assert jnp.allclose(o1, ref_fn(t1), atol=1e-5, rtol=1e-5)

    # 2) 128-aligned but ragged row count -> copy-free path, partial last block.
    t2 = jax.random.uniform(k2, (9, 1024), jnp.float32, minval=0.0, maxval=365.0)
    o2 = jax.block_until_ready(sine_predictor(t2, d, b))
    assert o2.shape == t2.shape
    assert jnp.allclose(o2, ref_fn(t2), atol=1e-5, rtol=1e-5)

    # 3) Odd, non-128-multiple shape -> minimal-pad fallback path.
    t3 = jax.random.uniform(k3, (7, 33), jnp.float32, minval=0.0, maxval=365.0)
    o3 = jax.block_until_ready(sine_predictor(t3, d, b))
    assert o3.shape == t3.shape
    assert jnp.allclose(o3, ref_fn(t3), atol=1e-5, rtol=1e-5)

    # 4) bf16 input, two grid tiles (megacore-split tiling path).
    t4 = jax.random.uniform(k4, (32, 1024), jnp.float32, minval=0.0,
                            maxval=365.0).astype(jnp.bfloat16)
    o4 = jax.block_until_ready(sine_predictor(t4, d, b))
    assert o4.shape == t4.shape and o4.dtype == jnp.bfloat16
    assert jnp.allclose(o4.astype(jnp.float32), ref_fn(t4).astype(jnp.float32),
                        atol=2e-2)

    print("KERNEL_OK")
</pallas_src>

<mosaic_0001>
module attributes {stable_mosaic.version = 11 : i64} {
  func.func @_sine_kernel(%arg0: i32, %arg1: memref<2xf32, #tpu.memory_space<smem>>, %arg2: memref<2x1024xf32, #tpu.memory_space<vmem>>, %arg3: memref<2x1024xf32, #tpu.memory_space<vmem>>) attributes {dimension_semantics = [#tpu.dimension_semantics<parallel>], iteration_bounds = array<i64: 1>, scalar_prefetch = 0 : i64, scratch_operands = 0 : i64, tpu.core_type = #tpu.core_type<tc>, window_params = [{transform_indices = @transform_0, window_bounds = array<i64: 2>}, {transform_indices = @transform_1, window_bounds = array<i64: 2, 1024>}, {transform_indices = @transform_2, window_bounds = array<i64: 2, 1024>}]} {
    %c0 = arith.constant 0 : index
    %0 = memref.load %arg1[%c0] : memref<2xf32, #tpu.memory_space<smem>>
    %c1 = arith.constant 1 : index
    %1 = memref.load %arg1[%c1] : memref<2xf32, #tpu.memory_space<smem>>
    %c0_0 = arith.constant 0 : index
    %c0_1 = arith.constant 0 : index
    %2 = vector.load %arg2[%c0_0, %c0_1] : memref<2x1024xf32, #tpu.memory_space<vmem>>, vector<2x1024xf32>
    %cst = arith.constant 0.017214207 : f32
    %3 = vector.broadcast %cst : f32 to vector<2x1024xf32>
    %4 = arith.mulf %3, %2 : vector<2x1024xf32>
    %5 = vector.broadcast %0 : f32 to vector<2x1024xf32>
    %6 = arith.addf %4, %5 : vector<2x1024xf32>
    %7 = math.sin %6 : vector<2x1024xf32>
    %8 = vector.broadcast %1 : f32 to vector<2x1024xf32>
    %9 = arith.addf %7, %8 : vector<2x1024xf32>
    %c0_2 = arith.constant 0 : index
    %c0_3 = arith.constant 0 : index
    %10 = vector.load %arg3[%c0_2, %c0_3] : memref<2x1024xf32, #tpu.memory_space<vmem>>, vector<2x1024xf32>
    tpu.vector_store %arg3[%c0_2, %c0_3], %9 {strides = array<i32>} : memref<2x1024xf32, #tpu.memory_space<vmem>>, vector<2x1024xf32>,
    return
  }
  func.func @transform_0(%arg0: i32) -> i32 {
    %c0_i32 = arith.constant 0 : i32
    %c0_i32_0 = arith.constant 0 : i32
    return %c0_i32 : i32
  }
  func.func @transform_1(%arg0: i32) -> (i32, i32) {
    %c0_i32 = arith.constant 0 : i32
    %c0_i32_0 = arith.constant 0 : i32
    return %arg0, %c0_i32 : i32, i32
  }
  func.func @transform_2(%arg0: i32) -> (i32, i32) {
    %c0_i32 = arith.constant 0 : i32
    %c0_i32_0 = arith.constant 0 : i32
    return %arg0, %c0_i32 : i32, i32
  }
}

</mosaic_0001>

<bundles_post_ra>
// kernel: tpu_custom_call.1
= control target key start
LH: loop header
LB: loop body
LE: loop exit
PB: predicated region body
PF: predicated region fallthrough
CT: control target
= control target key end

     0   :  { %7 = vsyncpa [#allocation5], 0  ;;  %s500_s0 = inlined_call_operand.hbm [shape: f32[2], index: 0, kind: input, shape index: {}]   ;;  %s501_s1 = inlined_call_operand.hbm [shape: f32[2,1024], index: 1, kind: input, shape index: {}]   ;;  %s502_s2 = inlined_call_operand.hbm [shape: f32[2,1024], index: 2, kind: output, shape index: {}]  }
   0x1   :  { %8 = vsyncpa [#allocation3], 0 }
   0x2   :  { %9 = vsyncpa [#allocation4], 0  ;;  %s307_s11 = scalar_lea.hbm %s500_s0, 16 }
   0x3   :  { %p308_p0 = scmp.ne.s32.totalorder %s500_s0, %s307_s11  ;;  %p311_p1 = scmp.lt.u32.totalorder %s307_s11, %s500_s0 }
   0x5   :  { %p313_p2 = pnand %p311_p1, %p308_p0 }
   0x7   :  { %316 = shalt.err (!%p313_p2)
}
   0x8   :  { %s367_s16 = smov [#allocation2]   ;;  %s368_s19 = smov [#allocation6]  }
   0x9   :  { %17 = dma.hbm_to_smem %s500_s0, 16, %s367_s16, [#allocation5]  }
   0xa   :  { %s24_s20 = sshll.u32 %s368_s19, 4  ;;  %s317_s23 = scalar_lea.hbm %s501_s1, 256  ;;  %s25_s20 = int_to_ptr.vmem [resolvable:$true] %s24_s20 }
   0xb   :  { %p318_p3 = scmp.ne.s32.totalorder %s501_s1, %s317_s23  ;;  %p321_p4 = scmp.lt.u32.totalorder %s317_s23, %s501_s1 }
   0xd   :  { %p323_p5 = pnand %p321_p4, %p318_p3 }
   0xf   :  { %326 = shalt.err (!%p323_p5)
}
  0x10   :  { %s327_s28 = scalar_lea.vmem %s25_s20, 256  ;;  %p332_p7 = scmp.lt.s32.totalorder %s25_s20, %s25_s20 }
  0x11   :  { %p328_p6 = scmp.ne.s32.totalorder %s25_s20, %s327_s28  ;;  %p333_p8 = scmp.lt.s32.totalorder %s327_s28, %s327_s28 }
  0x13   :  { %p334_p9 = por %p333_p8, %p332_p7 }
  0x15   :  { %p335_p10 = pnand %p334_p9, %p328_p6 }
  0x17   :  { %338 = shalt.err (!%p335_p10)
}
  0x18   :  { %27 = dma.hbm_to_vmem [thread:$0]  %s501_s1, 256, %s25_s20, [#allocation3]  }
  0x19   :  { %361 = dma.done.wait [#allocation5], 16  }
  0x1a   :  { %362 = vsyncadd [#allocation5], 4294967280 }
  0x1b   :  { %363 = dma.done.wait [#allocation3], 256  }
  0x1c   :  { %364 = vsyncadd [#allocation3], 4294967040 }
  0x1d   :  { %34 = sfence }
  0x1e   :  { %s35_s30 = sld [smem:[#allocation2]]  ;;  %v37_v0 = vld [vmem:[#allocation6] sm:$0xff]  ;;  %v38_v1 = vld [vmem:[#allocation6 + $0x8] sm:$0xff]  ;;  %v369_v29 = vmov 683565275   ;;  %s482_s1 = sld [smem:[#allocation2 + $0x1]] }
  0x1f   :  { %v39_v2 = vmul.f32 0.017214207, %v37_v0  ;;  %v40_v3 = vmul.f32 0.017214207, %v38_v1  ;;  %v370_v31 = vmov 2475754826  }
  0x20   :  { %v371_v33 = vmov 2131351028   ;;  %v372_v35 = vmov 2102212464   ;;  %v373_v37 = vmov 920167782  }
  0x21   :  { %v374_v45 = vmov 1326507024   ;;  %s375_s3 = smov [#allocation7]  }
  0x22   :  { %s263_s4 = sshll.u32 %s375_s3, 4  ;;  %s264_s4 = int_to_ptr.vmem [resolvable:$true] %s263_s4 }
  0x23   :  { %s339_s5 = scalar_lea.vmem %s264_s4, 256  ;;  %p344_p12 = scmp.lt.s32.totalorder %s264_s4, %s264_s4 }
  0x24   :  { %v41_v4 = vstv %s35_s30  ;;  %p340_p11 = scmp.ne.s32.totalorder %s264_s4, %s339_s5  ;;  %p345_p13 = scmp.lt.s32.totalorder %s339_s5, %s339_s5 }
  0x25   :  { %v415_v5 = vadd.f32 %v41_v4, %v39_v2  ;;  %v417_v6 = vadd.f32 %v41_v4, %v40_v3 }
  0x26   :  { %p346_p0 = por %p345_p13, %p344_p12 }
  0x27   :  { %v44_v7 = vand.u32 2147483647, %v415_v5  ;;  %v47_v8 = vand.u32 2139095040, %v415_v5  ;;  %v148_v9 = vand.u32 2147483647, %v417_v6  ;;  %v151_v10 = vand.u32 2139095040, %v417_v6 }
  0x28   :  { %vm46_vm14 = vcmp.lt.s32.totalorder %v415_v5, 0  ;;  %p347_p1 = pnand %p346_p0, %p340_p11 }
  0x29   :  { %v48_v11 = vshrl.u32 %v47_v8, 23  ;;  %v51_v12 = vand.u32 8388607, %v44_v7  ;;  %v152_v13 = vshrl.u32 %v151_v10, 23  ;;  %v155_v14 = vand.u32 8388607, %v148_v9 }
  0x2a   :  { %vm45_vm15 = vcmp.le.f32.partialorder %v44_v7, 0.7853982 }
  0x2b   :  { %v274_v15 = vadd.s32 4294967169, %v48_v11  ;;  %v278_v16 = vadd.s32 4294967169, %v152_v13  ;;  %v52_v18 = vor.u32 8388608, %v51_v12  ;;  %v156_v19 = vor.u32 8388608, %v155_v14 }
  0x2d   :  { %v54_v17 = vadd.s32 1, %v274_v15  ;;  %v158_v20 = vadd.s32 1, %v278_v16  ;;  %v427_v25 = vshll.u32 %v52_v18, 8  ;;  %v429_v27 = vshll.u32 %v156_v19, 8 }
  0x2f   :  { %vm55_vm0 = vcmp.gt.s32.totalorder %v54_v17, 0  ;;  %vm159_vm1 = vcmp.gt.s32.totalorder %v158_v20, 0 }
  0x30   :  { %v56_v21 = vsel %vm55_vm0, %v54_v17, 0  ;;  %v160_v24 = vsel %vm159_vm1, %v158_v20, 0  ;;  %vm150_vm0 = vcmp.lt.s32.totalorder %v417_v6, 0  ;;  %vm149_vm1 = vcmp.le.f32.partialorder %v148_v9, 0.7853982 }
  0x31   :  { %v57_v22 = vshrl.u32 %v56_v21, 5  ;;  %v58_v23 = vand.u32 31, %v56_v21  ;;  %v162_v26 = vand.u32 31, %v160_v24  ;;  %v431_v39 = vshrl.u32 %v160_v24, 5 }
  0x33   :  { %v59_v28 = vsub.s32 32, %v58_v23  ;;  %v61_v30 = vshll.u32 %v369_v29, %v58_v23  ;;  %v64_v32 = vshll.u32 %v370_v31, %v58_v23  ;;  %v67_v34 = vshll.u32 %v371_v33, %v58_v23 }
  0x34   :  { %v70_v36 = vshll.u32 %v372_v35, %v58_v23  ;;  %v73_v38 = vshll.u32 %v373_v37, %v58_v23  ;;  %vm76_vm2 = vcmp.lt.s32.totalorder %v57_v22, 1  ;;  %vm77_vm3 = vcmp.lt.s32.totalorder %v57_v22, 2 }
  0x35   :  { %v60_v40 = vshrl.u32 %v369_v29, %v59_v28  ;;  %v62_v41 = vshrl.u32 %v370_v31, %v59_v28  ;;  %v65_v42 = vshrl.u32 %v371_v33, %v59_v28  ;;  %v68_v43 = vshrl.u32 %v372_v35, %v59_v28 }
  0x36   :  { %v71_v44 = vshrl.u32 %v373_v37, %v59_v28  ;;  %v74_v46 = vshrl.u32 %v374_v45, %v59_v28  ;;  %vm79_vm4 = vcmp.lt.s32.totalorder %v57_v22, 4  ;;  %v163_v50 = vsub.s32 32, %v162_v26 }
  0x37   :  { %v63_v47 = vor.u32 %v62_v41, %v61_v30  ;;  %v66_v48 = vor.u32 %v65_v42, %v64_v32  ;;  %v69_v49 = vor.u32 %v68_v43, %v67_v34  ;;  %vm78_vm5 = vcmp.lt.s32.totalorder %v57_v22, 3 }
  0x38   :  { %v72_v51 = vor.u32 %v71_v44, %v70_v36  ;;  %v75_v52 = vor.u32 %v74_v46, %v73_v38  ;;  %v165_v53 = vshll.u32 %v369_v29, %v162_v26  ;;  %v168_v61 = vshll.u32 %v370_v31, %v162_v26 }
  0x39   :  { %v80_v54 = vsel %vm76_vm2, %v60_v40, %v63_v47  ;;  %v81_v55 = vsel %vm79_vm4, %v69_v49, 2102212464  ;;  %v84_v56 = vsel %vm76_vm2, %v63_v47, %v66_v48  ;;  %v88_v57 = vsel %vm76_vm2, %v66_v48, %v69_v49 }
  0x3a   :  { %v82_v58 = vsel %vm78_vm5, %v66_v48, %v81_v55  ;;  %v85_v59 = vsel %vm79_vm4, %v72_v51, 920167782  ;;  %v89_v60 = vsel %vm79_vm4, %v75_v52, 1326507024  ;;  %v164_v0 = vshrl.u32 %v369_v29, %v163_v50 }
  0x3b   :  { %v86_v62 = vsel %vm78_vm5, %v69_v49, %v85_v59  ;;  %v90_v63 = vsel %vm78_vm5, %v72_v51, %v89_v60  ;;  %v166_v1 = vshrl.u32 %v370_v31, %v163_v50  ;;  %v83_v2 = vsel %vm77_vm3, %v80_v54, %v82_v58 }
  0x3c   :  { %v87_v3 = vsel %vm77_vm3, %v84_v56, %v86_v62  ;;  %v91_v4 = vsel %vm77_vm3, %v88_v57, %v90_v63  ;;  %v169_v8 = vshrl.u32 %v371_v33, %v163_v50  ;;  %v171_v16 = vshll.u32 %v371_v33, %v162_v26 }
  0x3d   :  { %v440_v10 = vmul.u32.u64.low %v427_v25, %v91_v4  ;;  %v441_v11 = vmul.u32.u64.high %v427_v25, %v91_v4, %v440_v10  ;;  %v444_v12 = vmul.u32.u64.low %v427_v25, %v87_v3  ;;  %v445_v13 = vmul.u32.u64.high %v427_v25, %v87_v3, %v444_v12 }
  0x3e   :  { %v167_v14 = vor.u32 %v166_v1, %v165_v53  ;;  %v170_v15 = vor.u32 %v169_v8, %v168_v61  ;;  %v172_v17 = vshrl.u32 %v372_v35, %v163_v50  ;;  %v174_v18 = vshll.u32 %v372_v35, %v162_v26 }
  0x3f   :  { %v175_v19 = vshrl.u32 %v373_v37, %v163_v50  ;;  %v177_v20 = vshll.u32 %v373_v37, %v162_v26  ;;  %v178_v21 = vshrl.u32 %v374_v45, %v163_v50  ;;  %v99_v22 = vmul.u32 %v427_v25, %v83_v2 }
  0x40   :  { %v173_v23 = vor.u32 %v172_v17, %v171_v16  ;;  %vm180_vm6 = vcmp.lt.s32.totalorder %v431_v39, 1  ;;  %vm181_vm7 = vcmp.lt.s32.totalorder %v431_v39, 2  ;;  %vm101_vm8 = vc.u32 %v441_v11, %v444_v12 }
  0x41   :  { %v102_v24 = vadd.s32 1, %v445_v13  ;;  %v176_v28 = vor.u32 %v175_v19, %v174_v18  ;;  %vm182_vm9 = vcmp.lt.s32.totalorder %v431_v39, 3  ;;  %v179_v29 = vor.u32 %v178_v21, %v177_v20 }
  0x42   :  { %vm183_vm10 = vcmp.lt.s32.totalorder %v431_v39, 4  ;;  %v184_v30 = vsel %vm180_vm6, %v164_v0, %v167_v14  ;;  %v188_v26 = vsel %vm180_vm6, %v167_v14, %v170_v15  ;;  %v192_v33 = vsel %vm180_vm6, %v170_v15, %v173_v23 }
  0x43   :  { %v103_v31 = vsel %vm101_vm8, %v102_v24, %v445_v13  ;;  %v185_v25 = vsel %vm183_vm10, %v173_v23, 2102212464  ;;  %v189_v32 = vsel %vm183_vm10, %v176_v28, 920167782  ;;  %v193_v37 = vsel %vm183_vm10, %v179_v29, 1326507024 }
  0x44   :  { %v104_v34 = vadd.s32 %v103_v31, %v99_v22  ;;  %v186_v35 = vsel %vm182_vm9, %v170_v15, %v185_v25  ;;  %v190_v36 = vsel %vm182_vm9, %v173_v23, %v189_v32  ;;  %v194_v41 = vsel %vm182_vm9, %v176_v28, %v193_v37 }
  0x45   :  { %v187_v38 = vsel %vm181_vm7, %v184_v30, %v186_v35  ;;  %v191_v40 = vsel %vm181_vm7, %v188_v26, %v190_v36  ;;  %v195_v43 = vsel %vm181_vm7, %v192_v33, %v194_v41  ;;  %v100_v62 = vadd.s32 %v444_v12, %v441_v11 }
  0x46   :  { %v105_v42 = vadd.s32 536870912, %v104_v34  ;;  %v462_v44 = vmul.u32.u64.low %v429_v27, %v191_v40  ;;  %v463_v45 = vmul.u32.u64.high %v429_v27, %v191_v40, %v462_v44  ;;  %v203_v49 = vmul.u32 %v429_v27, %v187_v38 }
  0x47   :  { %v466_v46 = vmul.u32.u64.low %v429_v27, %v195_v43  ;;  %v467_v47 = vmul.u32.u64.high %v429_v27, %v195_v43, %v466_v46  ;;  %vm136_vm5 = vweird.f32 %v415_v5  ;;  %vm240_vm9 = vweird.f32 %v417_v6 }
  0x48   :  { %v106_v48 = vshrl.u32 %v105_v42, 30  ;;  %v206_v51 = vadd.s32 1, %v463_v45 }
  0x49   :  { %vm205_vm11 = vc.u32 %v467_v47, %v462_v44  ;;  %v204_v18 = vadd.s32 %v462_v44, %v467_v47 }
  0x4a   :  { %v107_v50 = vshll.u32 %v106_v48, 30  ;;  %v207_v39 = vsel %vm205_vm11, %v206_v51, %v463_v45  ;;  %v130_v11 = vsub.s32 4, %v106_v48 }
  0x4b   :  { %v208_v53 = vadd.s32 %v207_v39, %v203_v49 }
  0x4c   :  { %v108_v52 = vsub.s32 %v104_v34, %v107_v50  ;;  %v131_v30 = vsel %vm46_vm14, %v130_v11, %v106_v48 }
  0x4d   :  { %v209_v55 = vadd.s32 536870912, %v208_v53  ;;  %v133_v33 = vsel %vm45_vm15, 0, %v131_v30 }
  0x4e   :  { %v110_v54 = vsub.s32 0, %v108_v52  ;;  %v137_v38 = vadd.s32 3, %v133_v33 }
  0x4f   :  { %v210_v57 = vshrl.u32 %v209_v55, 30 }
  0x50   :  { %v275_v56 = vmin.u32 %v110_v54, %v108_v52  ;;  %v138_v42 = vand.u32 3, %v137_v38 }
  0x51   :  { %v211_v59 = vshll.u32 %v210_v57, 30  ;;  %v234_v37 = vsub.s32 4, %v210_v57 }
  0x52   :  { %v112_v58 = vclz %v275_v56  ;;  %vm143_vm2 = vcmp.eq.s32.totalorder %v138_v42, 2  ;;  %vm140_vm3 = vcmp.eq.s32.totalorder %v138_v42, 0  ;;  %vm139_vm4 = vcmp.lt.s32.totalorder %v138_v42, 2 }
  0x53   :  { %v212_v61 = vsub.s32 %v208_v53, %v211_v59  ;;  %v235_v41 = vsel %vm150_vm0, %v234_v37, %v210_v57 }
  0x54   :  { %v276_v60 = vadd.s32 4294967294, %v112_v58  ;;  %v237_v45 = vsel %vm149_vm1, 0, %v235_v41 }
  0x55   :  { %v214_v63 = vsub.s32 0, %v212_v61  ;;  %v241_v49 = vadd.s32 3, %v237_v45 }
  0x56   :  { %vm277_vm12 = vcmp.lt.s32.totalorder %v276_v60, 0 }
  0x57   :  { %v115_v27 = vsel %vm277_vm12, 0, %v276_v60  ;;  %v279_v3 = vmin.u32 %v214_v63, %v212_v61  ;;  %v242_v53 = vand.u32 3, %v241_v49 }
  0x58   :  { %v116_v0 = vsub.s32 32, %v115_v27  ;;  %v117_v1 = vshll.u32 %v108_v52, %v115_v27  ;;  %v120_v2 = vsub.s32 4294967266, %v115_v27  ;;  %v252_v52 = vstv %s482_s1 }
  0x59   :  { %v216_v10 = vclz %v279_v3  ;;  %vm247_vm6 = vcmp.eq.s32.totalorder %v242_v53, 2  ;;  %vm244_vm7 = vcmp.eq.s32.totalorder %v242_v53, 0  ;;  %vm243_vm8 = vcmp.lt.s32.totalorder %v242_v53, 2 }
  0x5a   :  { %v118_v4 = vshrl.u32 %v100_v62, %v116_v0  ;;  %v121_v8 = vadd.s32 127, %v120_v2 }
  0x5b   :  { %v280_v15 = vadd.s32 4294967294, %v216_v10 }
  0x5c   :  { %v119_v13 = vor.u32 %v118_v4, %v117_v1  ;;  %v122_v14 = vshll.u32 %v121_v8, 23 }
  0x5d   :  { %vm281_vm13 = vcmp.lt.s32.totalorder %v280_v15, 0 }
  0x5e   :  { %v123_v16 = vor.u32 4788187, %v122_v14  ;;  %v126_v17 = vcvt.s32.f32 %v119_v13  ;;  %v219_v12 = vsel %vm281_vm13, 0, %v280_v15 }
  0x5f   :  { %v220_v20 = vsub.s32 32, %v219_v12  ;;  %v221_v21 = vshll.u32 %v212_v61, %v219_v12  ;;  %v224_v22 = vsub.s32 4294967266, %v219_v12 }
  0x60   :  { %v124_v19 = vand.u32 2147483647, %v123_v16 }
  0x61   :  { %v222_v24 = vshrl.u32 %v204_v18, %v220_v20  ;;  %v225_v28 = vadd.s32 127, %v224_v22 }
  0x62   :  { %v127_v23 = vmul.f32 %v126_v17, %v124_v19 }
  0x63   :  { %v223_v26 = vor.u32 %v222_v24, %v221_v21  ;;  %v226_v31 = vshll.u32 %v225_v28, 23 }
  0x64   :  { %v128_v29 = vxor.u32 2147483648, %v127_v23 }
  0x65   :  { %v227_v34 = vor.u32 4788187, %v226_v31  ;;  %v230_v35 = vcvt.s32.f32 %v223_v26 }
  0x66   :  { %v129_v25 = vsel %vm46_vm14, %v128_v29, %v127_v23 }
  0x67   :  { %v132_v32 = vsel %vm45_vm15, %v415_v5, %v129_v25  ;;  %v228_v36 = vand.u32 2147483647, %v227_v34 }
  0x68   :  { %299 = vcosq.f32 %v132_v32 }
  0x69   :  { %301 = vsinq.f32 %v132_v32  ;;  %v231_v40 = vmul.f32 %v230_v35, %v228_v36 }
  0x6b   :  { %v232_v7 = vxor.u32 2147483648, %v231_v40 }
  0x6d   :  { %v233_v43 = vsel %vm150_vm0, %v232_v7, %v231_v40 }
  0x6e   :  { %v236_v44 = vsel %vm149_vm1, %v417_v6, %v233_v43 }
  0x6f   :  { %303 = vcosq.f32 %v236_v44 }
  0x70   :  { %305 = vsinq.f32 %v236_v44 }
  0x72   :  { %v300_v46 = vpop.eup %299 }
  0x73   :  { %v302_v47 = vpop.eup %301  ;;  %v144_v48 = vxor.u32 2147483648, %v300_v46 }
  0x74   :  { %v141_v9 = vxor.u32 2147483648, %v302_v47 }
  0x75   :  { %v145_v50 = vsel %vm143_vm2, %v144_v48, %v302_v47 }
  0x76   :  { %v142_v51 = vsel %vm140_vm3, %v300_v46, %v141_v9 }
  0x77   :  { %v146_v39 = vsel %vm139_vm4, %v142_v51, %v145_v50 }
  0x78   :  { %v147_v54 = vsel %vm136_vm5, nan, %v146_v39 }
  0x79   :  { %v253_v55 = vadd.f32 %v252_v52, %v147_v54  ;;  %v304_v56 = vpop.eup %303 }
  0x7a   :  { %v306_v57 = vpop.eup %305  ;;  %v248_v58 = vxor.u32 2147483648, %v304_v56 }
  0x7b   :  { %255 = vst [vmem:[#allocation7] sm:$0xff] %v253_v55  ;;  %v245_v59 = vxor.u32 2147483648, %v306_v57 }
  0x7c   :  { %v249_v60 = vsel %vm247_vm6, %v248_v58, %v306_v57 }
  0x7d   :  { %v246_v61 = vsel %vm244_vm7, %v304_v56, %v245_v59 }
  0x7e   :  { %v250_v5 = vsel %vm243_vm8, %v246_v61, %v249_v60 }
  0x7f   :  { %v251_v62 = vsel %vm240_vm9, nan, %v250_v5 }
  0x80   :  { %v254_v27 = vadd.f32 %v252_v52, %v251_v62 }
  0x82   :  { %256 = vst [vmem:[#allocation7 + $0x8] sm:$0xff] %v254_v27 }
  0x83   :  { %350 = shalt.err (!%p347_p1)
}
  0x84   :  { %s351_s8 = scalar_lea.hbm %s502_s2, 256 }
  0x85   :  { %p352_p2 = scmp.ne.s32.totalorder %s502_s2, %s351_s8  ;;  %p355_p3 = scmp.lt.u32.totalorder %s351_s8, %s502_s2 }
  0x87   :  { %p357_p4 = pnand %p355_p3, %p352_p2 }
  0x89   :  { %360 = shalt.err (!%p357_p4)
}
  0x8a   :  { %266 = dma.vmem_to_hbm [thread:$0]  %s264_s4, 256, %s502_s2, [#allocation4]  }
  0x8b   :  { %365 = dma.done.wait [#allocation4], 256  }
  0x8c   :  { %366 = vsyncadd [#allocation4], 4294967040 }
  0x8d   :  { %270 = vsyncpa [#allocation3], 1 }
  0x8e   :  { %271 = vsyncpa [#allocation4], 1 }
  0x8f   :  { %272 = vsyncpa [#allocation5], 1 }

</bundles_post_ra>
